<compile_context>
chip_gen: v7x
topology: tpu7x:2x2x1
jax: 0.10.0
libtpu: 0.0.40
codegen_flags: <defaults>
</compile_context>

<pallas_src>
import functools

import jax
import jax.numpy as jnp
from jax import lax
from jax.experimental import pallas as pl
from jax.experimental.pallas import tpu as pltpu

NODE_CLASS = 119          # self.node_class
CHARGE_POWER = 2          # args.EGNN_charge_power (Geom3D default)
EMB_DIM = 300             # self.emb_dim
NUM_TASKS = 1             # self.num_tasks
CLS_PAD = 128             # 119 classes -> one 128-lane block per charge power


def accumulate_kernel(xb_ref, out_ref, *, charge_power, inv_charge_scale,
                      num_graphs):
    """Per-graph accumulation of power-grouped one-hot charge features.

    out[g, p*128 + c] += sum_{n in tile, batch[n]==g} (x[n]/scale)^p * [x[n]==c]
    """
    step = pl.program_id(1)

    @pl.when(step == 0)
    def _init():
        out_ref[...] = jnp.zeros_like(out_ref)

    xb = xb_ref[...]                                     # (2, tile) int32
    x_row = xb[0:1, :]                                   # (1, tile) atom class
    b_row = xb[1:2, :]                                   # (1, tile) graph id
    tile = xb.shape[1]

    # Width-128 transposed one-hot: onehot_t[c, n] = (x[n] == c).
    cls_iota = lax.broadcasted_iota(jnp.int32, (CLS_PAD, tile), 0)
    onehot_t = (cls_iota == x_row).astype(jnp.float32)   # (128, tile)

    # Graph assignment; padded atoms carry sentinel id == num_graphs -> all 0.
    gid = lax.broadcasted_iota(jnp.int32, (num_graphs, tile), 0)
    assign = (gid == b_row).astype(jnp.float32)          # (G, tile)
    base = x_row.astype(jnp.float32) * inv_charge_scale  # (1, tile)

    dn = (((1,), (1,)), ((), ()))       # contract over the node axis of both
    a_p = assign
    for p in range(charge_power + 1):
        if p > 0:
            a_p = a_p * base            # fold charge power into (G, tile)
        part = lax.dot_general(a_p, onehot_t, dn,
                               preferred_element_type=jnp.float32)  # (G, 128)
        out_ref[:, p * CLS_PAD:(p + 1) * CLS_PAD] += part


def finalize_kernel(part_ref, w_emb_ref, b_emb_ref, w_head_ref, b_head_ref,
                    out_ref):
    """Combine per-core partials, embed, mean-pool, apply the head."""
    s = part_ref[0]
    for c in range(1, part_ref.shape[0]):
        s = s + part_ref[c]                              # (G, F_pad)
    # Every atom matches exactly one class lane of the p==0 block -> counts.
    counts = jnp.sum(s[:, :CLS_PAD], axis=1, keepdims=True)       # (G, 1)
    h_sum = jnp.dot(s, w_emb_ref[...], preferred_element_type=jnp.float32)
    pooled = (h_sum + counts * b_emb_ref[...]) / jnp.maximum(counts, 1.0)
    # graph_pred_linear (num_tasks == 1): VPU multiply + lane reduction.
    pred = jnp.sum(pooled * w_head_ref[...], axis=1, keepdims=True)
    out_ref[...] = pred + b_head_ref[...]                # (G, 1)


def geometry_forward(x_atoms, batch_idx, w_emb, b_emb, w_head, b_head, *,
                     num_graphs, tile_n=1024, num_cores=2):
    assert tile_n % 128 == 0
    x_flat = x_atoms.reshape(-1).astype(jnp.int32)
    b_flat = batch_idx.reshape(-1).astype(jnp.int32)
    N = x_flat.shape[0]
    F_in, H = w_emb.shape
    P1 = CHARGE_POWER + 1
    assert F_in == NODE_CLASS * P1
    assert w_head.shape[1] == 1, "VPU-reduce head assumes num_tasks == 1"
    G = num_graphs

    F_pad = CLS_PAD * P1                       # 384 (power-grouped blocks)
    H_pad = pl.cdiv(H, 128) * 128              # 300 -> 384

    # Node tiling: multiple of 128, sharded across `num_cores` parallel slices.
    tile = min(tile_n, max(128, pl.cdiv(N, 128) * 128))
    chunk = num_cores * tile
    N_pad = pl.cdiv(N, chunk) * chunk
    steps = N_pad // chunk

    # Pack x & batch into one lane-dense (2, N_pad) stream.  Padded atoms get
    # graph id == G (sentinel) so they never contribute to any graph.
    xb = jnp.stack([
        jnp.zeros((N_pad,), jnp.int32).at[:N].set(x_flat),
        jnp.full((N_pad,), G, jnp.int32).at[:N].set(b_flat),
    ], axis=0)

    acc_kernel = functools.partial(
        accumulate_kernel, charge_power=CHARGE_POWER,
        inv_charge_scale=1.0 / float(NODE_CLASS), num_graphs=G)

    partials = pl.pallas_call(
        acc_kernel,
        out_shape=jax.ShapeDtypeStruct((num_cores, G, F_pad), jnp.float32),
        grid=(num_cores, steps),
        in_specs=[pl.BlockSpec((2, tile), lambda c, i: (0, c * steps + i))],
        out_specs=pl.BlockSpec((None, G, F_pad), lambda c, i: (c, 0, 0)),
        compiler_params=pltpu.CompilerParams(
            dimension_semantics=("parallel", "arbitrary"),
            vmem_limit_bytes=32 * 1024 * 1024),
    )(xb)

    # Power-grouped, zero-padded parameters: row p*128+c <- original row c*P1+p
    # (padding rows/cols contribute exactly zero).
    w_emb_p = jnp.zeros((F_pad, H_pad), jnp.float32)
    for p in range(P1):
        w_emb_p = w_emb_p.at[p * CLS_PAD:p * CLS_PAD + NODE_CLASS, :H].set(
            w_emb[p::P1, :])
    b_emb_p = jnp.zeros((1, H_pad), jnp.float32).at[:, :H].set(
        b_emb.reshape(1, H))
    w_head_row = jnp.zeros((1, H_pad), jnp.float32).at[:, :H].set(
        w_head[:, 0].reshape(1, H))
    b_head_p = b_head.reshape(1, 1).astype(jnp.float32)

    out = pl.pallas_call(
        finalize_kernel,
        out_shape=jax.ShapeDtypeStruct((G, 1), jnp.float32),
        grid=(1,),
        in_specs=[
            pl.BlockSpec((num_cores, G, F_pad), lambda i: (0, 0, 0)),
            pl.BlockSpec((F_pad, H_pad), lambda i: (0, 0)),
            pl.BlockSpec((1, H_pad), lambda i: (0, 0)),
            pl.BlockSpec((1, H_pad), lambda i: (0, 0)),
            pl.BlockSpec((1, 1), lambda i: (0, 0)),
        ],
        out_specs=pl.BlockSpec((G, 1), lambda i: (0, 0)),
        compiler_params=pltpu.CompilerParams(
            dimension_semantics=("arbitrary",),
            vmem_limit_bytes=32 * 1024 * 1024),
    )(partials, w_emb_p, b_emb_p, w_head_row, b_head_p)
    return jnp.squeeze(out)


def reference_forward(x_atoms, batch_idx, w_emb, b_emb, w_head, b_head, *,
                      num_graphs):
    """Pure-JAX reference mirroring the PyTorch EGNN-branch semantics."""
    x = x_atoms.reshape(-1)
    one_hot = jax.nn.one_hot(x, NODE_CLASS, dtype=jnp.float32)
    charge = (x[:, None].astype(jnp.float32) / float(NODE_CLASS)) ** \
        jnp.arange(CHARGE_POWER + 1, dtype=jnp.float32)
    atom_scalars = (one_hot[:, :, None] * charge[:, None, :]).reshape(
        x.shape[0], -1)
    h = atom_scalars @ w_emb + b_emb
    b = batch_idx.reshape(-1)
    assign = (jnp.arange(num_graphs)[:, None] == b[None, :]).astype(jnp.float32)
    pooled = (assign @ h) / jnp.maximum(assign.sum(1, keepdims=True), 1.0)
    return (pooled @ w_head + b_head).squeeze()


if __name__ == "__main__":
    key = jax.random.PRNGKey(0)
    k1, k2, k3 = jax.random.split(key, 3)

    F_in = NODE_CLASS * (CHARGE_POWER + 1)             # 357

    # Deterministic synthetic parameters (shapes from module __init__).
    w_emb = 0.02 * jax.random.normal(k2, (F_in, EMB_DIM), jnp.float32)
    b_emb = 0.01 * jnp.ones((1, EMB_DIM), jnp.float32)
    w_head = 0.02 * jax.random.normal(k3, (EMB_DIM, NUM_TASKS), jnp.float32)
    b_head = 0.1 * jnp.ones((1, NUM_TASKS), jnp.float32)

    # --- test 1: small case (N=32 atoms, G=4 graphs, 1 step per core) --------
    N, G = 32, 4
    x_atoms = jax.random.randint(k1, (N,), 1, NODE_CLASS, dtype=jnp.int32)
    batch_idx = jnp.repeat(jnp.arange(G, dtype=jnp.int32), N // G)

    pred = geometry_forward(x_atoms, batch_idx, w_emb, b_emb, w_head, b_head,
                            num_graphs=G)
    pred = jax.block_until_ready(pred)
    ref = reference_forward(x_atoms, batch_idx, w_emb, b_emb, w_head, b_head,
                            num_graphs=G)
    assert pred.shape == ref.shape
    assert jnp.allclose(pred, ref, atol=1e-4, rtol=1e-4)

    # --- test 2: multi-step accumulation + padding (N=600, tile=128, G=6) ----
    N2, G2 = 600, 6
    x2 = jax.random.randint(k1, (N2,), 1, NODE_CLASS, dtype=jnp.int32)
    b2 = jnp.repeat(jnp.arange(G2, dtype=jnp.int32), N2 // G2)

    pred2 = geometry_forward(x2, b2, w_emb, b_emb, w_head, b_head,
                             num_graphs=G2, tile_n=128)
    pred2 = jax.block_until_ready(pred2)
    ref2 = reference_forward(x2, b2, w_emb, b_emb, w_head, b_head,
                             num_graphs=G2)
    assert pred2.shape == ref2.shape
    assert jnp.allclose(pred2, ref2, atol=1e-4, rtol=1e-4)

    print("KERNEL_OK")
</pallas_src>

<mosaic_0001>
module attributes {stable_mosaic.version = 11 : i64} {
  func.func @accumulate_kernel(%arg0: i32, %arg1: i32, %arg2: memref<2x128xi32, #tpu.memory_space<vmem>>, %arg3: memref<1x4x384xf32, #tpu.memory_space<vmem>>) attributes {dimension_semantics = [#tpu.dimension_semantics<parallel>, #tpu.dimension_semantics<arbitrary>], iteration_bounds = array<i64: 2, 1>, scalar_prefetch = 0 : i64, scratch_operands = 0 : i64, tpu.core_type = #tpu.core_type<tc>, window_params = [{transform_indices = @transform_0, window_bounds = array<i64: 2, 128>}, {transform_indices = @transform_1, window_bounds = array<i64: 1, 4, 384>}]} {
    %c0_i32 = arith.constant 0 : i32
    %0 = arith.cmpi eq, %arg1, %c0_i32 : i32
    %1 = arith.extui %0 : i1 to i32
    %c0_i32_0 = arith.constant 0 : i32
    %2 = arith.cmpi ne, %1, %c0_i32_0 : i32
    scf.if %2 {
      %cst_21 = arith.constant 0.000000e+00 : f32
      %44 = vector.broadcast %cst_21 : f32 to vector<4x384xf32>
      %c0_22 = arith.constant 0 : index
      %c0_23 = arith.constant 0 : index
      %c0_24 = arith.constant 0 : index
      %45 = vector.load %arg3[%c0_22, %c0_23, %c0_24] : memref<1x4x384xf32, #tpu.memory_space<vmem>>, vector<1x4x384xf32>
      %46 = vector.shape_cast %45 : vector<1x4x384xf32> to vector<4x384xf32>
      %47 = vector.shape_cast %44 : vector<4x384xf32> to vector<1x4x384xf32>
      tpu.vector_store %arg3[%c0_22, %c0_23, %c0_24], %47 {strides = array<i32>} : memref<1x4x384xf32, #tpu.memory_space<vmem>>, vector<1x4x384xf32>,
    } else {
    }
    %c0 = arith.constant 0 : index
    %c0_1 = arith.constant 0 : index
    %3 = vector.load %arg2[%c0, %c0_1] : memref<2x128xi32, #tpu.memory_space<vmem>>, vector<2x128xi32>
    %4 = vector.extract_strided_slice %3 {offsets = [0, 0], sizes = [1, 128], strides = [1, 1]} : vector<2x128xi32> to vector<1x128xi32>
    %5 = vector.extract_strided_slice %3 {offsets = [1, 0], sizes = [1, 128], strides = [1, 1]} : vector<2x128xi32> to vector<1x128xi32>
    %6 = tpu.iota {dimensions = array<i32: 0>} : vector<128x128xi32>
    %7 = vector.broadcast %4 : vector<1x128xi32> to vector<128x128xi32>
    %8 = arith.cmpi eq, %6, %7 : vector<128x128xi32>
    %9 = arith.extui %8 : vector<128x128xi1> to vector<128x128xi32>
    %10 = arith.sitofp %9 : vector<128x128xi32> to vector<128x128xf32>
    %11 = tpu.iota {dimensions = array<i32: 0>} : vector<4x128xi32>
    %12 = vector.broadcast %5 : vector<1x128xi32> to vector<4x128xi32>
    %13 = arith.cmpi eq, %11, %12 : vector<4x128xi32>
    %14 = arith.extui %13 : vector<4x128xi1> to vector<4x128xi32>
    %15 = arith.sitofp %14 : vector<4x128xi32> to vector<4x128xf32>
    %16 = arith.sitofp %4 : vector<1x128xi32> to vector<1x128xf32>
    %cst = arith.constant 0.00840336177 : f32
    %17 = vector.broadcast %cst : f32 to vector<1x128xf32>
    %18 = arith.mulf %16, %17 : vector<1x128xf32>
    %cst_2 = arith.constant dense<0.000000e+00> : vector<4x128xf32>
    %19 = tpu.matmul %15, %10, %cst_2 {dimension_numbers = #tpu.dot_dimension_numbers<[1], [1], [0], [0], [0, 0, 1, 0], [], []>} : vector<4x128xf32>, vector<128x128xf32>, vector<4x128xf32> -> vector<4x128xf32>
    %c0_3 = arith.constant 0 : index
    %c0_4 = arith.constant 0 : index
    %c0_5 = arith.constant 0 : index
    %20 = vector.load %arg3[%c0_3, %c0_4, %c0_5] : memref<1x4x384xf32, #tpu.memory_space<vmem>>, vector<1x4x128xf32>
    %21 = vector.shape_cast %20 : vector<1x4x128xf32> to vector<4x128xf32>
    %22 = arith.addf %21, %19 : vector<4x128xf32>
    %c0_6 = arith.constant 0 : index
    %c0_7 = arith.constant 0 : index
    %c0_8 = arith.constant 0 : index
    %23 = vector.load %arg3[%c0_6, %c0_7, %c0_8] : memref<1x4x384xf32, #tpu.memory_space<vmem>>, vector<1x4x128xf32>
    %24 = vector.shape_cast %23 : vector<1x4x128xf32> to vector<4x128xf32>
    %25 = vector.shape_cast %22 : vector<4x128xf32> to vector<1x4x128xf32>
    tpu.vector_store %arg3[%c0_6, %c0_7, %c0_8], %25 {strides = array<i32>} : memref<1x4x384xf32, #tpu.memory_space<vmem>>, vector<1x4x128xf32>,
    %26 = vector.broadcast %18 : vector<1x128xf32> to vector<4x128xf32>
    %27 = arith.mulf %15, %26 : vector<4x128xf32>
    %cst_9 = arith.constant dense<0.000000e+00> : vector<4x128xf32>
    %28 = tpu.matmul %27, %10, %cst_9 {dimension_numbers = #tpu.dot_dimension_numbers<[1], [1], [0], [0], [0, 0, 1, 0], [], []>} : vector<4x128xf32>, vector<128x128xf32>, vector<4x128xf32> -> vector<4x128xf32>
    %c0_10 = arith.constant 0 : index
    %c0_11 = arith.constant 0 : index
    %c128 = arith.constant 128 : index
    %29 = vector.load %arg3[%c0_10, %c0_11, %c128] : memref<1x4x384xf32, #tpu.memory_space<vmem>>, vector<1x4x128xf32>
    %30 = vector.shape_cast %29 : vector<1x4x128xf32> to vector<4x128xf32>
    %31 = arith.addf %30, %28 : vector<4x128xf32>
    %c0_12 = arith.constant 0 : index
    %c0_13 = arith.constant 0 : index
    %c128_14 = arith.constant 128 : index
    %32 = vector.load %arg3[%c0_12, %c0_13, %c128_14] : memref<1x4x384xf32, #tpu.memory_space<vmem>>, vector<1x4x128xf32>
    %33 = vector.shape_cast %32 : vector<1x4x128xf32> to vector<4x128xf32>
    %34 = vector.shape_cast %31 : vector<4x128xf32> to vector<1x4x128xf32>
    tpu.vector_store %arg3[%c0_12, %c0_13, %c128_14], %34 {strides = array<i32>} : memref<1x4x384xf32, #tpu.memory_space<vmem>>, vector<1x4x128xf32>,
    %35 = vector.broadcast %18 : vector<1x128xf32> to vector<4x128xf32>
    %36 = arith.mulf %27, %35 : vector<4x128xf32>
    %cst_15 = arith.constant dense<0.000000e+00> : vector<4x128xf32>
    %37 = tpu.matmul %36, %10, %cst_15 {dimension_numbers = #tpu.dot_dimension_numbers<[1], [1], [0], [0], [0, 0, 1, 0], [], []>} : vector<4x128xf32>, vector<128x128xf32>, vector<4x128xf32> -> vector<4x128xf32>
    %c0_16 = arith.constant 0 : index
    %c0_17 = arith.constant 0 : index
    %c256 = arith.constant 256 : index
    %38 = vector.load %arg3[%c0_16, %c0_17, %c256] : memref<1x4x384xf32, #tpu.memory_space<vmem>>, vector<1x4x128xf32>
    %39 = vector.shape_cast %38 : vector<1x4x128xf32> to vector<4x128xf32>
    %40 = arith.addf %39, %37 : vector<4x128xf32>
    %c0_18 = arith.constant 0 : index
    %c0_19 = arith.constant 0 : index
    %c256_20 = arith.constant 256 : index
    %41 = vector.load %arg3[%c0_18, %c0_19, %c256_20] : memref<1x4x384xf32, #tpu.memory_space<vmem>>, vector<1x4x128xf32>
    %42 = vector.shape_cast %41 : vector<1x4x128xf32> to vector<4x128xf32>
    %43 = vector.shape_cast %40 : vector<4x128xf32> to vector<1x4x128xf32>
    tpu.vector_store %arg3[%c0_18, %c0_19, %c256_20], %43 {strides = array<i32>} : memref<1x4x384xf32, #tpu.memory_space<vmem>>, vector<1x4x128xf32>,
    return
  }
  func.func @transform_0(%arg0: i32, %arg1: i32) -> (i32, i32) {
    %c1_i32 = arith.constant 1 : i32
    %0 = arith.muli %arg0, %c1_i32 : i32
    %1 = arith.addi %0, %arg1 : i32
    %c0_i32 = arith.constant 0 : i32
    %c0_i32_0 = arith.constant 0 : i32
    return %c0_i32, %1 : i32, i32
  }
  func.func @transform_1(%arg0: i32, %arg1: i32) -> (i32, i32, i32) {
    %c0_i32 = arith.constant 0 : i32
    %c0_i32_0 = arith.constant 0 : i32
    %c0_i32_1 = arith.constant 0 : i32
    return %arg0, %c0_i32, %c0_i32_0 : i32, i32, i32
  }
}

</mosaic_0001>

<bundles_post_ra>
// kernel: tpu_custom_call.1
= control target key start
LH: loop header
LB: loop body
LE: loop exit
PB: predicated region body
PF: predicated region fallthrough
CT: control target
= control target key end

     0   :  { %6 = vsyncpa [#allocation3], 0  ;;  %s1429_s0 = inlined_call_operand.hbm [shape: s32[2,256], index: 0, kind: input, shape index: {}]   ;;  %s1430_s1 = inlined_call_operand.hbm [shape: f32[2,4,384], index: 1, kind: output, shape index: {}]  }
   0x1   :  { %8 = vsyncpa [#allocation3 + $0x1], 0 }
   0x2   :  { %9 = vsyncpa [#allocation4], 0 }
   0x3   :  { %11 = vsyncpa [#allocation4 + $0x1], 0  ;;  %s1057_s6 = smov 0   ;;  %s1059_s7 = smov 0  }
   0x4   :  { %s1061_s8 = smov 0   ;;  %s1063_s9 = smov 0  }
   0x5   :  { %s1065_s10 = smov 0   ;;  %s1067_s11 = smov 0  }
   0x6 LB: > { %s552_s12 = sadd.s32 4294967295, %s1038_s11   ;;  %s553_s13 = sadd.s32 4294967294, %s1038_s11   ;;  %s1038_s11 = sphi %s1067_s11, %s17_s11   ;;  %s1034_s10 = sphi %s1065_s10, %s1462_s10   ;;  %s1030_s9 = sphi %s1063_s9, %s1461_s9   ;;  %s1026_s8 = sphi %s1061_s8, %s1460_s8   ;;  %s1022_s7 = sphi %s1059_s7, %s1459_s7   ;;  %s1018_s6 = sphi %s1057_s6, %s1458_s6  }
   0x7   : > { %s29_s14 = sadd.s32 1, %s1034_s10  ;;  %s38_s15 = sadd.s32 1, %s1026_s8 }
   0x8   : > { %p31_p0 = scmp.ge.s32.totalorder %s29_s14, 2  ;;  %p45_p1 = scmp.ne.s32.totalorder %s1026_s8, %s1022_s7 }
   0x9   : > { %p46_p2 = scmp.eq.s32.totalorder %s1038_s11, 0  ;;  %p51_p3 = scmp.ne.s32.totalorder %s1022_s7, %s1018_s6 }
   0xa   : > { %s1464_s14 = smov (%p31_p0, %s29_s14), 0  ;;  %p52_p5 = scmp.eq.s32.totalorder %s552_s12, 0 }
   0xb   : > { %p1098_p4 = por %p46_p2, %p45_p1  ;;  %s35_s17 = ssub.s32 %s1034_s10, %s1464_s14 }
   0xc   : > { %p75_p6 = scmp.eq.s32.totalorder %s552_s12, 1  ;;  %p36_p7 = scmp.eq.s32.totalorder %s35_s17, 0 }
   0xd   : > { %p1104_p8 = por %p52_p5, %p51_p3  ;;  %p81_p10 = scmp.eq.s32.totalorder %s553_s13, 1 }
   0xe   : > { %p1108_p9 = por %p75_p6, %p45_p1  ;;  %p871_p13 = scmp.lt.s32.totalorder %s1038_s11, 2 }
   0xf   : > { %s1113_s20 = scalar_select %p36_p7, %s1026_s8, %s38_s15  }
  0x10   : > { %s1434_s19 = scalar_select %p1108_p9, 1, 0 }
  0x11   : > { %p1115_p11 = por %p81_p10, %p51_p3  ;;  %s101_s22 = sand.u32 1, %s1026_s8  }
  0x12   : > { %s556_s23 = sshll.u32 %s101_s22, 1  ;;  %s557_s24 = sshll.u32 %s1034_s10, 5 }
  0x13   : > { %s1435_s21 = scalar_select %p1115_p11, 1, 0 }
  0x14   : > { %s1126_s27 = scalar_lea.hbm %s1429_s0, %s557_s24  ;;  %s105_s28 = scalar_lea.vmem [#allocation2], %s556_s23 }
  0x15   : > { %s113_s29 = sshll.u32 %s105_s28, 4  ;;  %p1132_p0 = pnand %p871_p13, %p1098_p4  ;;  %s1128_s29 = int_to_ptr.vmem [resolvable:$true] %s113_s29 }
  0x16   : > { %s102_s2 = scalar_lea.sflag [#allocation3], %s101_s22  ;;  %s926_s3 = scalar_lea.hbm %s1126_s27, 32 }
  0x17   : > { %p927_p3 = scmp.ne.s32.totalorder %s1126_s27, %s926_s3  ;;  %p928_p5 = pneg %p1132_p0 }
  0x18   : > { %s931_s12 = scalar_lea.hbm %s1429_s0, 64  ;;  %p932_p4 = scmp.lt.u32.totalorder %s1126_s27, %s1429_s0 }
  0x19   : > { %p929_p6 = pnand %p928_p5, %p927_p3  ;;  %p933_p10 = scmp.lt.u32.totalorder %s931_s12, %s926_s3 }
  0x1a   : > { %p935_p12 = scmp.lt.u32.totalorder %s926_s3, %s1126_s27 }
  0x1b   : > { %p930_p7 = pneg %p929_p6  ;;  %p934_p13 = por %p933_p10, %p932_p4 }
  0x1d   : > { %p936_p1 = por %p935_p12, %p934_p13 }
  0x1f   : > { %p937_p2 = pnand %p936_p1, %p930_p7 }
  0x21   : > { %940 = shalt.err (!%p937_p2)
}
  0x22   : > { %s941_s16 = scalar_lea.vmem %s1128_s29, 32  ;;  %s1040_s17 = smov [#allocation2]  }
  0x23   : > { %p942_p3 = scmp.ne.s32.totalorder %s1128_s29, %s941_s16  ;;  %s946_s22 = sshll.u32 %s1040_s17, 4  ;;  %s947_s22 = int_to_ptr.vmem [resolvable:$false] %s946_s22 }
  0x24   : > { %s948_s23 = scalar_lea.vmem %s947_s22, 64  ;;  %p949_p9 = scmp.lt.s32.totalorder %s1128_s29, %s947_s22 }
  0x25   : > { %p944_p6 = pnand %p942_p3, %p928_p5  ;;  %p950_p4 = scmp.lt.s32.totalorder %s948_s23, %s941_s16 }
  0x27   : > { %p945_p11 = pneg %p944_p6  ;;  %p951_p10 = por %p950_p4, %p949_p9 }
  0x29   : > { %p952_p12 = pnand %p951_p10, %p945_p11 }
  0x2b   : > { %955 = shalt.err (!%p952_p12)
}
  0x2c   : > { %866 = dma.hbm_to_vmem [thread:$0]  (!%p1132_p0), %s1126_s27, 32, %s1128_s29, %s102_s2  }
  0x2d   : > { %p1437_p1 = scmp.lt.s32.totalorder %s1038_s11, 3  ;;  %p1438_p2 = scmp.ge.s32.totalorder %s1038_s11, 1 }
  0x2f   : > { %p119_p5 = pnand %p1438_p2, %p1437_p1 }
  0x30   : > { %s1168_s24 = sand.u32 (!%p119_p5), 1, %s1022_s7  }
  0x31   : > { %122 = sbr.rel (%p119_p5) target bundleno = 422 (0x1a6), region = 24  ;;  %s559_s25 = sshll.u32 (!%p119_p5), %s1168_s24, 1 }
  0x32   : > { %s125_s26 = scalar_lea.sflag (!%p119_p5), [#allocation3], %s1168_s24  ;;  %s128_s28 = scalar_lea.vmem (!%p119_p5), [#allocation2], %s559_s25 }
  0x38   : > { %1009 = dma.done.wait (%p1104_p8), %s125_s26, 32  }
  0x39   : > { %1011 = vsyncadd (%p1104_p8), %s125_s26, 4294967264  ;;  %v155_v0 = vlaneseq  ;;  %v1041_v1 = vmov 0.0|0.0   ;;  %vm1042_vm0 = vmmov 0   ;;  %v1043_v3 = vmov 0.0   ;;  %v154_v6 = vld [vmem:[%s128_s28] sm:$0x3] }
  0x3a   : > { %785 = vmatprep.subr.bf16.mxu0 %v1041_v1  ;;  %809 = vmatprep.subr.bf16.mxu1 %v1041_v1  ;;  %v231_v11 = vcvt.s32.f32 %v154_v6  ;;  %s857_s18 = smul.u32 12, %s1168_s24  ;;  %v1044_v13 = vmov 1.0|1.0   ;;  %v1045_v39 = vmov 1.0   ;;  %s459_s5 = scalar_lea.sflag [#allocation4], %s1168_s24 }
  0x3b   : > { %v1178_v2 = vshrl.u32 %v155_v0, 7  ;;  %712 = vmatprep.mubr.msk.f32.mxu0 %vm1042_vm0, %v1043_v3  ;;  %747 = vmatprep.mubr.msk.f32.mxu1 %vm1042_vm0, %v1043_v3  ;;  %s858_s29 = smul.u32 192, %s1030_s9  ;;  %p1455_p9 = scmp.ne.s32.totalorder %s1434_s19, 0 }
  0x3c   : > { %v232_v15 = vmul.f32 0.008403362, %v231_v11  ;;  %s1210_s27 = scalar_lea.vmem [#allocation5], %s857_s18  ;;  %s1046_s9 = smov [#allocation5]  }
  0x3d   : > { %v174_v4 = vsub.s32 0, %v1178_v2  ;;  %v157_v5 = vadd.s32 8, %v1178_v2  ;;  %v158_v8 = vadd.s32 16, %v1178_v2  ;;  %v159_v9 = vadd.s32 24, %v1178_v2  ;;  %152 = vst [vmem:[%s1210_s27] sm:$0xff] %v1043_v3  ;;  %153 = vst [vmem:[%s1210_s27 + $0x8] sm:$0xf] %v1043_v3  ;;  %s1379_s4 = scalar_lea.hbm %s1430_s1, %s858_s29 }
  0x3e   : > { %v226_v10 = vsub.s32 1, %v1178_v2  ;;  %v160_v19 = vadd.s32 32, %v1178_v2  ;;  %v161_v20 = vadd.s32 40, %v1178_v2  ;;  %v162_v24 = vadd.s32 48, %v1178_v2  ;;  %s473_s30 = sshll.u32 %s1210_s27, 4  ;;  %s960_s13 = sshll.u32 %s1046_s9, 4  ;;  %s1381_s30 = int_to_ptr.vmem [resolvable:$true] %s473_s30  ;;  %s961_s13 = int_to_ptr.vmem [resolvable:$false] %s960_s13 }
  0x3f   : > { %v1186_v7 = vrot.slane %v154_v6, %v174_v4  ;;  %v309_v16 = vrot.slane %v232_v15, %v174_v4  ;;  %v163_v25 = vadd.s32 56, %v1178_v2  ;;  %v164_v27 = vadd.s32 64, %v1178_v2  ;;  %s956_s12 = scalar_lea.vmem %s1381_s30, 192  ;;  %s962_s15 = scalar_lea.vmem %s961_s13, 384 }
  0x40   : > { %v1205_v14 = vrot.slane %v154_v6, %v226_v10  ;;  %v165_v28 = vadd.s32 72, %v1178_v2  ;;  %v166_v30 = vadd.s32 80, %v1178_v2  ;;  %v167_v31 = vadd.s32 88, %v1178_v2  ;;  %p957_p8 = scmp.ne.s32.totalorder %s1381_s30, %s956_s12  ;;  %p963_p7 = scmp.lt.s32.totalorder %s1381_s30, %s961_s13 }
  0x41   : > { %vm176_vm1 = vcmp.eq.s32.totalorder %v1178_v2, %v1186_v7  ;;  %vm177_vm2 = vcmp.eq.s32.totalorder %v157_v5, %v1186_v7  ;;  %vm178_vm4 = vcmp.eq.s32.totalorder %v158_v8, %v1186_v7  ;;  %vm179_vm5 = vcmp.eq.s32.totalorder %v159_v9, %v1186_v7  ;;  %p964_p13 = scmp.lt.s32.totalorder %s962_s15, %s956_s12 }
  0x42   : > { %vm1194_vm3 = vmpackc.low %vm177_vm2, %vm176_vm1  ;;  %vm228_vm6 = vcmp.eq.s32.totalorder %v1178_v2, %v1205_v14  ;;  %vm180_vm8 = vcmp.eq.s32.totalorder %v160_v19, %v1186_v7  ;;  %vm181_vm9 = vcmp.eq.s32.totalorder %v161_v20, %v1186_v7  ;;  %vm182_vm11 = vcmp.eq.s32.totalorder %v162_v24, %v1186_v7  ;;  %p958_p11 = pnand %p957_p8, %p1455_p9 }
  0x43   : > { %787 = vmatpush3.bf16.xpose.msk.msra.mxu0 %vm1194_vm3, %v1044_v13  ;;  %811 = vmatpush3.bf16.xpose.msk.msra.mxu1 %vm1194_vm3, %v1044_v13  ;;  %vm1219_vm7 = vmpackc.low %vm179_vm5, %vm178_vm4  ;;  %v576_v18 = vsel %vm228_vm6, 1.0, %v1043_v3  ;;  %vm183_vm12 = vcmp.eq.s32.totalorder %v163_v25, %v1186_v7  ;;  %vm184_vm14 = vcmp.eq.s32.totalorder %v164_v27, %v1186_v7  ;;  %vm185_vm15 = vcmp.eq.s32.totalorder %v165_v28, %v1186_v7  ;;  %p965_p3 = por %p964_p13, %p963_p7 }
  0x44   : > { %788 = vmatprep.subr.bf16.mxu0 %v1041_v1  ;;  %812 = vmatprep.subr.bf16.mxu1 %v1041_v1  ;;  %v310_v21 = vmul.f32 %v576_v18, %v309_v16  ;;  %vm1241_vm10 = vmpackc.low %vm181_vm9, %vm180_vm8  ;;  %vm186_vm2 = vcmp.eq.s32.totalorder %v166_v30, %v1186_v7  ;;  %vm187_vm4 = vcmp.eq.s32.totalorder %v167_v31, %v1186_v7  ;;  %v168_v33 = vadd.s32 96, %v1178_v2  ;;  %v303_v40 = vld [vmem:[%s1210_s27] sm:$0xf]  ;;  %v381_v42 = vld [vmem:[%s1210_s27 + $0x4] sm:$0xf]  ;;  %p959_p0 = pneg %p958_p11 }
  0x45   : > { %vm1257_vm13 = vmpackc.low %vm183_vm12, %vm182_vm11  ;;  %v169_v34 = vadd.s32 104, %v1178_v2  ;;  %v170_v36 = vadd.s32 112, %v1178_v2  ;;  %v171_v37 = vadd.s32 120, %v1178_v2  ;;  %v455_v48 = vld [vmem:[%s1210_s27 + $0x8] sm:$0xf] }
  0x46   : > { %v1232_v22 = vmul.f32 %v310_v21, %v309_v16  ;;  %vm1273_vm1 = vmpackc.low %vm185_vm15, %vm184_vm14  ;;  %vm188_vm8 = vcmp.eq.s32.totalorder %v168_v33, %v1186_v7  ;;  %p966_p6 = pnand %p965_p3, %p959_p0 }
  0x47   : > { %vm1289_vm5 = vmpackc.low %vm187_vm4, %vm186_vm2  ;;  %vm189_vm9 = vcmp.eq.s32.totalorder %v169_v34, %v1186_v7  ;;  %vm190_vm12 = vcmp.eq.s32.totalorder %v170_v36, %v1186_v7  ;;  %vm191_vm14 = vcmp.eq.s32.totalorder %v171_v37, %v1186_v7 }
  0x48   : > { %vm1305_vm11 = vmpackc.low %vm189_vm9, %vm188_vm8 }
  0x49   : > { %vm1321_vm15 = vmpackc.low %vm191_vm14, %vm190_vm12 }
  0x4b   : > { %790 = vmatpush3.bf16.xpose.msk.msra.mxu0 %vm1219_vm7, %v1044_v13  ;;  %814 = vmatpush3.bf16.xpose.msk.msra.mxu1 %vm1219_vm7, %v1044_v13 }
  0x4c   : > { %791 = vmatprep.subr.bf16.mxu0 %v1041_v1  ;;  %815 = vmatprep.subr.bf16.mxu1 %v1041_v1 }
  0x53   : > { %793 = vmatpush3.bf16.xpose.msk.msra.mxu0 %vm1241_vm10, %v1044_v13  ;;  %817 = vmatpush3.bf16.xpose.msk.msra.mxu1 %vm1241_vm10, %v1044_v13 }
  0x54   : > { %794 = vmatprep.subr.bf16.mxu0 %v1041_v1  ;;  %818 = vmatprep.subr.bf16.mxu1 %v1041_v1 }
  0x5b   : > { %796 = vmatpush3.bf16.xpose.msk.msra.mxu0 %vm1257_vm13, %v1044_v13  ;;  %820 = vmatpush3.bf16.xpose.msk.msra.mxu1 %vm1257_vm13, %v1044_v13 }
  0x5c   : > { %797 = vmatprep.subr.bf16.mxu0 %v1041_v1  ;;  %821 = vmatprep.subr.bf16.mxu1 %v1041_v1 }
  0x63   : > { %799 = vmatpush3.bf16.xpose.msk.msra.mxu0 %vm1273_vm1, %v1044_v13  ;;  %823 = vmatpush3.bf16.xpose.msk.msra.mxu1 %vm1273_vm1, %v1044_v13 }
  0x64   : > { %800 = vmatprep.subr.bf16.mxu0 %v1041_v1  ;;  %824 = vmatprep.subr.bf16.mxu1 %v1041_v1 }
  0x6b   : > { %802 = vmatpush3.bf16.xpose.msk.msra.mxu0 %vm1289_vm5, %v1044_v13  ;;  %826 = vmatpush3.bf16.xpose.msk.msra.mxu1 %vm1289_vm5, %v1044_v13 }
  0x6c   : > { %803 = vmatprep.subr.bf16.mxu0 %v1041_v1  ;;  %827 = vmatprep.subr.bf16.mxu1 %v1041_v1 }
  0x73   : > { %805 = vmatpush3.bf16.xpose.msk.msra.mxu0 %vm1305_vm11, %v1044_v13  ;;  %829 = vmatpush3.bf16.xpose.msk.msra.mxu1 %vm1305_vm11, %v1044_v13 }
  0x74   : > { %806 = vmatprep.subr.bf16.mxu0 %v1041_v1  ;;  %830 = vmatprep.subr.bf16.mxu1 %v1041_v1 }
  0x7b   : > { %808 = vmatpush3.bf16.xpose.msk.msra.mxu0 %vm1321_vm15, %v1044_v13  ;;  %832 = vmatpush3.bf16.xpose.msk.msra.mxu1 %vm1321_vm15, %v1044_v13 }
  0x7c   : > { %833 = vmatprep.subr.bf16.mxu0 %v1041_v1 }
  0x82   : > { %713 = vmatmul.mubr.msk.f32.vlgmr.msra.gmra.mrb[0].mxu0 %vm228_vm6, %v1045_v39  ;;  %748 = vmatmul.mubr.f32.vlgmr.msra.gmra.mrb[0].mxu1 %v310_v21 }
  0x83   : > { %835 = vmatpush3.bf16.xpose.msk.msra.mxu0 %vm1194_vm3, %v1044_v13  ;;  %782 = vmatprep.mubr.msk.f32.mxu0 %vm1042_vm0, %v1043_v3 }
  0x84   : > { %836 = vmatprep.subr.bf16.mxu0 %v1041_v1 }
  0x8b   : > { %838 = vmatpush3.bf16.xpose.msk.msra.mxu0 %vm1219_vm7, %v1044_v13 }
  0x8c   : > { %839 = vmatprep.subr.bf16.mxu0 %v1041_v1 }
  0x93   : > { %841 = vmatpush3.bf16.xpose.msk.msra.mxu0 %vm1241_vm10, %v1044_v13 }
  0x94   : > { %842 = vmatprep.subr.bf16.mxu0 %v1041_v1 }
  0x9b   : > { %844 = vmatpush3.bf16.xpose.msk.msra.mxu0 %vm1257_vm13, %v1044_v13 }
  0x9c   : > { %845 = vmatprep.subr.bf16.mxu0 %v1041_v1 }
  0xa3   : > { %847 = vmatpush3.bf16.xpose.msk.msra.mxu0 %vm1273_vm1, %v1044_v13 }
  0xa4   : > { %848 = vmatprep.subr.bf16.mxu0 %v1041_v1 }
  0xab   : > { %850 = vmatpush3.bf16.xpose.msk.msra.mxu0 %vm1289_vm5, %v1044_v13 }
  0xac   : > { %851 = vmatprep.subr.bf16.mxu0 %v1041_v1 }
  0xb3   : > { %853 = vmatpush3.bf16.xpose.msk.msra.mxu0 %vm1305_vm11, %v1044_v13 }
  0xb4   : > { %854 = vmatprep.subr.bf16.mxu0 %v1041_v1 }
  0xbb   : > { %856 = vmatpush3.bf16.xpose.msk.msra.mxu0 %vm1321_vm15, %v1044_v13 }
  0xc2   : > { %783 = vmatmul.mubr.f32.vlgmr.msra.gmra.mrb[2].mxu0 %v1232_v22 }
 0x155   : > { %v299_v41 = vpop.f32.mrb[0].mxu0  ;;  %v377_v45 = vpop.f32.mrb[0].mxu1 }
 0x156   : > { %v304_v43 = vadd.f32 %v303_v40, %v299_v41  ;;  %v714_v44 = vpop.f32.mrb[1].mxu0  ;;  %v382_v46 = vadd.f32 %v381_v42, %v377_v45  ;;  %v749_v47 = vpop.f32.mrb[1].mxu1 }
 0x158   : > { %305 = vst [vmem:[%s1210_s27] sm:$0xf] %v304_v43  ;;  %383 = vst [vmem:[%s1210_s27 + $0x4] sm:$0xf] %v382_v46 }
 0x195   : > { %v451_v49 = vpop.f32.mrb[2].mxu0 }
 0x196   : > { %v456_v50 = vadd.f32 %v455_v48, %v451_v49  ;;  %v784_v51 = vpop.f32.mrb[3].mxu0 }
 0x198   : > { %457 = vst [vmem:[%s1210_s27 + $0x8] sm:$0xf] %v456_v50 }
 0x199   : > { %969 = shalt.err (!%p966_p6)
}
 0x19a   : > { %s970_s16 = scalar_lea.hbm %s1379_s4, 192  ;;  %s974_s23 = scalar_lea.hbm %s1430_s1, 384 }
 0x19b   : > { %p971_p4 = scmp.ne.s32.totalorder %s1379_s4, %s970_s16  ;;  %p975_p1 = scmp.lt.u32.totalorder %s1379_s4, %s1430_s1 }
 0x19c   : > { %p976_p2 = scmp.lt.u32.totalorder %s974_s23, %s970_s16  ;;  %p978_p8 = scmp.lt.u32.totalorder %s970_s16, %s1379_s4 }
 0x19d   : > { %p972_p10 = pnand %p971_p4, %p1455_p9 }
 0x19e   : > { %p977_p5 = por %p976_p2, %p975_p1 }
 0x19f   : > { %p973_p12 = pneg %p972_p10 }
 0x1a0   : > { %p979_p11 = por %p978_p8, %p977_p5 }
 0x1a2   : > { %p980_p0 = pnand %p979_p11, %p973_p12 }
 0x1a4   : > { %983 = shalt.err (!%p980_p0)
}
 0x1a5   : > { %861 = dma.vmem_to_hbm [thread:$0]  (%p1455_p9), %s1381_s30, 192, %s1379_s4, %s459_s5  }
 0x1a6 PF: > { %s485_s26 = sand.u32 1, %s1018_s6   ;;  %p1456_p7 = scmp.ne.s32.totalorder %s1435_s21, 0 }
 0x1a7   : > { %p1457_p13 = scmp.ge.s32.totalorder %s1038_s11, 2  ;;  %s486_s28 = scalar_lea.sflag [#allocation4], %s485_s26 }
 0x1a9   : > { %p868_p3 = pnand %p1457_p13, %p1456_p7 }
 0x1ab   : > { %1013 = dma.done.wait (!%p868_p3), %s486_s28, 192  }
 0x1ac   : > { %1015 = vsyncadd (!%p868_p3), %s486_s28, 4294967104  ;;  %s17_s11 = sadd.s32 1, %s1038_s11   ;;  %s1458_s6 = smov %s1022_s7 }
 0x1ad   : > { %p14_p6 = scmp.ge.s32.totalorder %s17_s11, 4   ;;  %s1459_s7 = smov %s1026_s8 }
 0x1ae   : > { %s1460_s8 = smov %s1113_s20  ;;  %s1461_s9 = smov %s1034_s10 }
 0x1af   : > { %s1462_s10 = smov %s1464_s14  ;;  %16 = sbr.rel (!%p14_p6) target bundleno = 6 (0x6), region = 73 }
 0x1b6   :  { %491 = vsyncpa [#allocation3], 1 }
 0x1b7   :  { %493 = vsyncpa [#allocation3 + $0x1], 1 }
 0x1b8   :  { %494 = vsyncpa [#allocation4], 1 }
 0x1b9   :  { %496 = vsyncpa [#allocation4 + $0x1], 1 }

</bundles_post_ra>
